<compile_context>
chip_gen: v7x
topology: tpu7x:2x2x1
jax: 0.10.0
libtpu: 0.0.40
codegen_flags: <defaults>
</compile_context>

<pallas_src>
import jax
import jax.numpy as jnp
from jax.experimental import pallas as pl
from jax.experimental.pallas import tpu as pltpu

HIDDEN = 64                 # DEFAULT_HIDDEN_UNITS in the torch module
MAX_BATCH_TILE = 2048       # rows per grid step
LANES = 128


def _round_up(x, m):
    return (x + m - 1) // m * m


def _cdiv(a, b):
    return -(-a // b)


# ---------------------------------------------------------------------------
# Kernel: one grid step = one batch tile; ALL heads fused into 3 matmuls.
# ---------------------------------------------------------------------------
def _dac_fused_kernel(x_ref, w1_ref, b1_ref, w2_ref, b2_ref, w3_ref, b3_ref,
                      o_ref):
    # x_ref : (tb, obs_dim)      bf16
    # w1_ref: (obs_dim, NH)      bf16   layer-1 weights concatenated over heads
    # w2_ref: (NH, NH)           bf16   block-diagonal layer-2 weights
    # w3_ref: (NH, out_pad)      bf16   lane-packed layer-3 weights
    # b*_ref: (1, ...)           f32
    # o_ref : (tb, out_pad)      f32    lane-packed pre-activation logits
    x = x_ref[...]
    h1 = jnp.tanh(
        jnp.dot(x, w1_ref[...], preferred_element_type=jnp.float32)
        + b1_ref[...])
    # tanh kept in f32 (v5e has no bf16 EUP); cast only for the MXU feed.
    h2 = jnp.tanh(
        jnp.dot(h1.astype(jnp.bfloat16), w2_ref[...],
                preferred_element_type=jnp.float32) + b2_ref[...])
    out = (jnp.dot(h2.astype(jnp.bfloat16), w3_ref[...],
                   preferred_element_type=jnp.float32) + b3_ref[...])
    o_ref[...] = out.astype(o_ref.dtype)   # single lane-dense (tb, 128) store


# ---------------------------------------------------------------------------
# Parameter init. Head order:
#   [opt0.policy, opt0.termination, opt1.policy, opt1.termination, ...,
#    master_policy_net, value_net]
# (torch uses orthogonal init + zero bias; exact init is irrelevant to the
#  forward semantics, so uniform init is used here for a deterministic test.)
# ---------------------------------------------------------------------------
def init_dac_params(key, obs_dim, action_dim, num_options, hidden=HIDDEN):
    out_dims = []
    for _ in range(num_options):
        out_dims += [action_dim, 1]          # policy_net, termination_net
    out_dims += [num_options, num_options]   # master_policy_net, value_net
    n_nets = len(out_dims)
    nh = n_nets * hidden
    out_total = sum(out_dims)
    out_pad = _round_up(max(out_total, 1), LANES)

    def unif(k, shape, fan_in):
        bound = 1.0 / (fan_in ** 0.5)
        return jax.random.uniform(k, shape, jnp.float32, -bound, bound)

    w1_l, b1_l, w2_l, b2_l, w3_l, b3_l = [], [], [], [], [], []
    for od in out_dims:
        key, k1, kb1, k2, kb2, k3, kb3 = jax.random.split(key, 7)
        w1_l.append(unif(k1, (obs_dim, hidden), obs_dim))
        b1_l.append(unif(kb1, (hidden,), obs_dim))
        w2_l.append(unif(k2, (hidden, hidden), hidden))
        b2_l.append(unif(kb2, (hidden,), hidden))
        w3_l.append(unif(k3, (hidden, od), hidden))
        b3_l.append(unif(kb3, (od,), hidden))

    # Fused / packed parameters for the kernel. Padded lanes stay exactly zero.
    w1_cat = jnp.concatenate(w1_l, axis=1)                   # (obs_dim, NH)
    b1_cat = jnp.concatenate(b1_l)[None, :]                  # (1, NH)
    w2_bd = jnp.zeros((nh, nh), jnp.float32)
    for n, w2 in enumerate(w2_l):
        w2_bd = w2_bd.at[n * hidden:(n + 1) * hidden,
                         n * hidden:(n + 1) * hidden].set(w2)
    b2_cat = jnp.concatenate(b2_l)[None, :]                  # (1, NH)
    w3_pack = jnp.zeros((nh, out_pad), jnp.float32)
    b3_pack = jnp.zeros((1, out_pad), jnp.float32)
    off = 0
    for n, (od, w3, b3) in enumerate(zip(out_dims, w3_l, b3_l)):
        w3_pack = w3_pack.at[n * hidden:(n + 1) * hidden, off:off + od].set(w3)
        b3_pack = b3_pack.at[0, off:off + od].set(b3)
        off += od

    return {
        # kernel params
        "w1_cat": w1_cat, "b1_cat": b1_cat,
        "w2_bd": w2_bd, "b2_cat": b2_cat,
        "w3_pack": w3_pack, "b3_pack": b3_pack,
        # torch initializes each LowerNetwork.std to zeros
        "std": jnp.zeros((num_options, action_dim), jnp.float32),
        # per-head params kept only for the pure-JAX reference
        "w1": w1_l, "b1": b1_l, "w2": w2_l, "b2": b2_l, "w3": w3_l, "b3": b3_l,
    }


# ---------------------------------------------------------------------------
# Output assembly (DACNetwork.forward dict) from the lane-packed raw logits.
# ---------------------------------------------------------------------------
def _assemble_outputs(raw, params, action_dim, num_options, batch):
    # raw: (B, out_pad). Column layout per head order above:
    #   [pol0(A), term0(1), pol1(A), term1(1), ..., master(K), value(K), 0-pad]
    lower_w = num_options * (action_dim + 1)
    lower = raw[:, :lower_w].reshape(batch, num_options, action_dim + 1)
    mean = jnp.tanh(lower[..., :action_dim])                       # [B, K, A]
    beta = jax.nn.sigmoid(lower[..., action_dim])                  # [B, K]
    mp_raw = raw[:, lower_w:lower_w + num_options]                 # [B, K]
    q_raw = raw[:, lower_w + num_options:lower_w + 2 * num_options]
    master_policy = jax.nn.softmax(mp_raw, axis=-1)
    std = jnp.broadcast_to(jax.nn.softplus(params["std"])[None],
                           (batch, num_options, action_dim))
    return {"mean": mean, "std": std, "beta": beta,
            "q_option": q_raw, "master_policy": master_policy}


# ---------------------------------------------------------------------------
# Pallas forward
# ---------------------------------------------------------------------------
def dac_network_forward(x, params, action_dim, num_options):
    w1 = params["w1_cat"].astype(jnp.bfloat16)
    w2 = params["w2_bd"].astype(jnp.bfloat16)
    w3 = params["w3_pack"].astype(jnp.bfloat16)
    b1, b2, b3 = params["b1_cat"], params["b2_cat"], params["b3_pack"]
    obs_dim, nh = w1.shape
    out_pad = w3.shape[-1]
    batch = x.shape[0]

    # Adaptive batch tile: multiple of 16 (bf16 sublane packing), bounded pad
    # waste, and >=2 grid points for batch>=32 so v7x's two TCs both get work.
    ntiles = max(_cdiv(batch, MAX_BATCH_TILE), 2 if batch >= 32 else 1)
    tb = _round_up(_cdiv(batch, ntiles), 16)
    bp = _round_up(batch, tb)
    xp = x if bp == batch else jnp.pad(x, ((0, bp - batch), (0, 0)))
    xp = xp.astype(jnp.bfloat16)

    grid = (bp // tb,)

    flops = 2 * bp * (obs_dim * nh + nh * nh + nh * out_pad)
    transcendentals = 2 * bp * nh
    bytes_accessed = (bp * obs_dim * 2                                   # x
                      + (obs_dim * nh + nh * nh + nh * out_pad) * 2      # weights
                      + (2 * nh + out_pad) * 4                           # biases
                      + bp * out_pad * 4)                                # out

    raw = pl.pallas_call(
        _dac_fused_kernel,
        out_shape=jax.ShapeDtypeStruct((bp, out_pad), jnp.float32),
        grid_spec=pltpu.PrefetchScalarGridSpec(
            num_scalar_prefetch=0,
            grid=grid,
            in_specs=[
                pl.BlockSpec((tb, obs_dim), lambda i: (i, 0)),    # x
                pl.BlockSpec((obs_dim, nh), lambda i: (0, 0)),    # w1_cat
                pl.BlockSpec((1, nh), lambda i: (0, 0)),          # b1_cat
                pl.BlockSpec((nh, nh), lambda i: (0, 0)),         # w2_bd
                pl.BlockSpec((1, nh), lambda i: (0, 0)),          # b2_cat
                pl.BlockSpec((nh, out_pad), lambda i: (0, 0)),    # w3_pack
                pl.BlockSpec((1, out_pad), lambda i: (0, 0)),     # b3_pack
            ],
            out_specs=pl.BlockSpec((tb, out_pad), lambda i: (i, 0)),
        ),
        compiler_params=pltpu.CompilerParams(
            dimension_semantics=("parallel",),
            vmem_limit_bytes=32 * 1024 * 1024,   # headroom vs v7x 64 MiB VMEM
        ),
        cost_estimate=pl.CostEstimate(flops=flops,
                                      transcendentals=transcendentals,
                                      bytes_accessed=bytes_accessed),
    )(xp, w1, b1, w2, b2, w3, b3)

    raw = raw[:batch]
    return _assemble_outputs(raw, params, action_dim, num_options, batch)


# ---------------------------------------------------------------------------
# Pure-JAX reference (per-head, mirrors kernel math: bf16 dot inputs, f32 acc).
# Note: this verifies self-consistency with the bf16-MXU kernel; parity with
# an f32 PyTorch DACNetwork is within bf16 matmul rounding (~1e-2 rel worst).
# ---------------------------------------------------------------------------
def dac_forward_ref(x, params, action_dim, num_options):
    def dense(v, w, b):
        return jnp.dot(v.astype(jnp.bfloat16), w.astype(jnp.bfloat16),
                       preferred_element_type=jnp.float32) + b

    def mlp(n):
        h1 = jnp.tanh(dense(x, params["w1"][n], params["b1"][n]))
        h2 = jnp.tanh(dense(h1, params["w2"][n], params["b2"][n]))
        return dense(h2, params["w3"][n], params["b3"][n])

    means, betas = [], []
    for k in range(num_options):
        means.append(jnp.tanh(mlp(2 * k))[:, None, :])
        betas.append(jax.nn.sigmoid(mlp(2 * k + 1)))
    master_policy = jax.nn.softmax(mlp(2 * num_options), axis=-1)
    q_option = mlp(2 * num_options + 1)

    batch = x.shape[0]
    std = jnp.broadcast_to(jax.nn.softplus(params["std"])[None],
                           (batch, num_options, action_dim))
    return {"mean": jnp.concatenate(means, axis=1),
            "std": std,
            "beta": jnp.concatenate(betas, axis=1),
            "q_option": q_option,
            "master_policy": master_policy}


if __name__ == "__main__":
    obs_dim, action_dim, num_options, batch = 16, 4, 3, 8

    key = jax.random.PRNGKey(0)
    key, kx = jax.random.split(key)
    x = jax.random.normal(kx, (batch, obs_dim), dtype=jnp.float32)
    params = init_dac_params(key, obs_dim, action_dim, num_options)

    out = dac_network_forward(x, params, action_dim, num_options)
    out = jax.block_until_ready(out)

    ref = dac_forward_ref(x, params, action_dim, num_options)

    assert out["mean"].shape == (batch, num_options, action_dim)
    assert out["std"].shape == (batch, num_options, action_dim)
    assert out["beta"].shape == (batch, num_options)
    assert out["q_option"].shape == (batch, num_options)
    assert out["master_policy"].shape == (batch, num_options)
    for k in ("mean", "std", "beta", "q_option", "master_policy"):
        assert jnp.allclose(out[k], ref[k], atol=2e-3, rtol=2e-3), k

    print("KERNEL_OK")
</pallas_src>

<mosaic_0001>
module attributes {stable_mosaic.version = 11 : i64} {
  func.func @_dac_fused_kernel(%arg0: i32, %arg1: memref<16x16xbf16, #tpu.memory_space<vmem>>, %arg2: memref<16x512xbf16, #tpu.memory_space<vmem>>, %arg3: memref<1x512xf32, #tpu.memory_space<vmem>>, %arg4: memref<512x512xbf16, #tpu.memory_space<vmem>>, %arg5: memref<1x512xf32, #tpu.memory_space<vmem>>, %arg6: memref<512x128xbf16, #tpu.memory_space<vmem>>, %arg7: memref<1x128xf32, #tpu.memory_space<vmem>>, %arg8: memref<16x128xf32, #tpu.memory_space<vmem>>) attributes {dimension_semantics = [#tpu.dimension_semantics<parallel>], iteration_bounds = array<i64: 1>, scalar_prefetch = 0 : i64, scratch_operands = 0 : i64, tpu.core_type = #tpu.core_type<tc>, window_params = [{transform_indices = @transform_0, window_bounds = array<i64: 16, 16>}, {pipeline_mode = #tpu.pipeline_mode<synchronous>, transform_indices = @transform_1, window_bounds = array<i64: 16, 512>}, {pipeline_mode = #tpu.pipeline_mode<synchronous>, transform_indices = @transform_2, window_bounds = array<i64: 1, 512>}, {pipeline_mode = #tpu.pipeline_mode<synchronous>, transform_indices = @transform_3, window_bounds = array<i64: 512, 512>}, {pipeline_mode = #tpu.pipeline_mode<synchronous>, transform_indices = @transform_4, window_bounds = array<i64: 1, 512>}, {pipeline_mode = #tpu.pipeline_mode<synchronous>, transform_indices = @transform_5, window_bounds = array<i64: 512, 128>}, {pipeline_mode = #tpu.pipeline_mode<synchronous>, transform_indices = @transform_6, window_bounds = array<i64: 1, 128>}, {transform_indices = @transform_7, window_bounds = array<i64: 16, 128>}]} {
    %c0 = arith.constant 0 : index
    %c0_0 = arith.constant 0 : index
    %0 = vector.load %arg1[%c0, %c0_0] : memref<16x16xbf16, #tpu.memory_space<vmem>>, vector<16x16xbf16>
    %c0_1 = arith.constant 0 : index
    %c0_2 = arith.constant 0 : index
    %1 = vector.load %arg2[%c0_1, %c0_2] : memref<16x512xbf16, #tpu.memory_space<vmem>>, vector<16x512xbf16>
    %cst = arith.constant dense<0.000000e+00> : vector<16x512xf32>
    %2 = tpu.matmul %0, %1, %cst {dimension_numbers = #tpu.dot_dimension_numbers<[1], [0], [0], [1], [0, 0, 1, 1], [], []>} : vector<16x16xbf16>, vector<16x512xbf16>, vector<16x512xf32> -> vector<16x512xf32>
    %c0_3 = arith.constant 0 : index
    %c0_4 = arith.constant 0 : index
    %3 = vector.load %arg3[%c0_3, %c0_4] : memref<1x512xf32, #tpu.memory_space<vmem>>, vector<1x512xf32>
    %4 = vector.broadcast %3 : vector<1x512xf32> to vector<16x512xf32>
    %5 = arith.addf %2, %4 : vector<16x512xf32>
    %6 = math.tanh %5 : vector<16x512xf32>
    %7 = arith.truncf %6 : vector<16x512xf32> to vector<16x512xbf16>
    %c0_5 = arith.constant 0 : index
    %c0_6 = arith.constant 0 : index
    %8 = vector.load %arg4[%c0_5, %c0_6] : memref<512x512xbf16, #tpu.memory_space<vmem>>, vector<512x512xbf16>
    %cst_7 = arith.constant dense<0.000000e+00> : vector<16x512xf32>
    %9 = tpu.matmul %7, %8, %cst_7 {dimension_numbers = #tpu.dot_dimension_numbers<[1], [0], [0], [1], [0, 0, 1, 1], [], []>} : vector<16x512xbf16>, vector<512x512xbf16>, vector<16x512xf32> -> vector<16x512xf32>
    %c0_8 = arith.constant 0 : index
    %c0_9 = arith.constant 0 : index
    %10 = vector.load %arg5[%c0_8, %c0_9] : memref<1x512xf32, #tpu.memory_space<vmem>>, vector<1x512xf32>
    %11 = vector.broadcast %10 : vector<1x512xf32> to vector<16x512xf32>
    %12 = arith.addf %9, %11 : vector<16x512xf32>
    %13 = math.tanh %12 : vector<16x512xf32>
    %14 = arith.truncf %13 : vector<16x512xf32> to vector<16x512xbf16>
    %c0_10 = arith.constant 0 : index
    %c0_11 = arith.constant 0 : index
    %15 = vector.load %arg6[%c0_10, %c0_11] : memref<512x128xbf16, #tpu.memory_space<vmem>>, vector<512x128xbf16>
    %cst_12 = arith.constant dense<0.000000e+00> : vector<16x128xf32>
    %16 = tpu.matmul %14, %15, %cst_12 {dimension_numbers = #tpu.dot_dimension_numbers<[1], [0], [0], [1], [0, 0, 1, 1], [], []>} : vector<16x512xbf16>, vector<512x128xbf16>, vector<16x128xf32> -> vector<16x128xf32>
    %c0_13 = arith.constant 0 : index
    %c0_14 = arith.constant 0 : index
    %17 = vector.load %arg7[%c0_13, %c0_14] : memref<1x128xf32, #tpu.memory_space<vmem>>, vector<1x128xf32>
    %18 = vector.broadcast %17 : vector<1x128xf32> to vector<16x128xf32>
    %19 = arith.addf %16, %18 : vector<16x128xf32>
    %c0_15 = arith.constant 0 : index
    %c0_16 = arith.constant 0 : index
    %20 = vector.load %arg8[%c0_15, %c0_16] : memref<16x128xf32, #tpu.memory_space<vmem>>, vector<16x128xf32>
    tpu.vector_store %arg8[%c0_15, %c0_16], %19 {strides = array<i32>} : memref<16x128xf32, #tpu.memory_space<vmem>>, vector<16x128xf32>,
    return
  }
  func.func @transform_0(%arg0: i32) -> (i32, i32) {
    %c0_i32 = arith.constant 0 : i32
    %c0_i32_0 = arith.constant 0 : i32
    return %arg0, %c0_i32 : i32, i32
  }
  func.func @transform_1(%arg0: i32) -> (i32, i32) {
    %c0_i32 = arith.constant 0 : i32
    %c0_i32_0 = arith.constant 0 : i32
    %c0_i32_1 = arith.constant 0 : i32
    return %c0_i32, %c0_i32_0 : i32, i32
  }
  func.func @transform_2(%arg0: i32) -> (i32, i32) {
    %c0_i32 = arith.constant 0 : i32
    %c0_i32_0 = arith.constant 0 : i32
    %c0_i32_1 = arith.constant 0 : i32
    return %c0_i32, %c0_i32_0 : i32, i32
  }
  func.func @transform_3(%arg0: i32) -> (i32, i32) {
    %c0_i32 = arith.constant 0 : i32
    %c0_i32_0 = arith.constant 0 : i32
    %c0_i32_1 = arith.constant 0 : i32
    return %c0_i32, %c0_i32_0 : i32, i32
  }
  func.func @transform_4(%arg0: i32) -> (i32, i32) {
    %c0_i32 = arith.constant 0 : i32
    %c0_i32_0 = arith.constant 0 : i32
    %c0_i32_1 = arith.constant 0 : i32
    return %c0_i32, %c0_i32_0 : i32, i32
  }
  func.func @transform_5(%arg0: i32) -> (i32, i32) {
    %c0_i32 = arith.constant 0 : i32
    %c0_i32_0 = arith.constant 0 : i32
    %c0_i32_1 = arith.constant 0 : i32
    return %c0_i32, %c0_i32_0 : i32, i32
  }
  func.func @transform_6(%arg0: i32) -> (i32, i32) {
    %c0_i32 = arith.constant 0 : i32
    %c0_i32_0 = arith.constant 0 : i32
    %c0_i32_1 = arith.constant 0 : i32
    return %c0_i32, %c0_i32_0 : i32, i32
  }
  func.func @transform_7(%arg0: i32) -> (i32, i32) {
    %c0_i32 = arith.constant 0 : i32
    %c0_i32_0 = arith.constant 0 : i32
    return %arg0, %c0_i32 : i32, i32
  }
}

</mosaic_0001>

<bundles_post_ra>
// kernel: tpu_custom_call.1
= control target key start
LH: loop header
LB: loop body
LE: loop exit
PB: predicated region body
PF: predicated region fallthrough
CT: control target
= control target key end

     0   :  { %12 = vsyncpa [#allocation3], 0  ;;  %s2367_s0 = inlined_call_operand.hbm [shape: bf16[16,16], index: 0, kind: input, shape index: {}]   ;;  %s2368_s1 = inlined_call_operand.hbm [shape: bf16[16,512], index: 1, kind: input, shape index: {}]   ;;  %s2369_s2 = inlined_call_operand.vmem [shape: f32[1,512], index: 2, kind: input, shape index: {}]   ;;  %s2370_s3 = inlined_call_operand.hbm [shape: bf16[512,512], index: 3, kind: input, shape index: {}]   ;;  %s2371_s4 = inlined_call_operand.vmem [shape: f32[1,512], index: 4, kind: input, shape index: {}]   ;;  %s2372_s5 = inlined_call_operand.hbm [shape: bf16[512,128], index: 5, kind: input, shape index: {}]   ;;  %s2373_s6 = inlined_call_operand.vmem [shape: f32[1,128], index: 6, kind: input, shape index: {}]   ;;  %s2374_s7 = inlined_call_operand.hbm [shape: f32[16,128], index: 7, kind: output, shape index: {}]  }
   0x1   :  { %13 = vsyncpa [#allocation6], 0 }
   0x2   :  { %14 = vsyncpa [#allocation9], 0 }
   0x3   :  { %15 = vsyncpa [#allocation4], 0  ;;  %s2199_s24 = smov [#allocation5]   ;;  %s2081_s28 = scalar_lea.hbm %s2368_s1, 512 }
   0x4   :  { %s33_s25 = sshll.u32 %s2199_s24, 4  ;;  %p2082_p0 = scmp.ne.s32.totalorder %s2368_s1, %s2081_s28  ;;  %s34_s25 = int_to_ptr.vmem [resolvable:$true] %s33_s25 }
   0x5   :  { %p2085_p1 = scmp.lt.u32.totalorder %s2081_s28, %s2368_s1 }
   0x7   :  { %p2087_p2 = pnand %p2085_p1, %p2082_p0 }
   0x9   :  { %2090 = shalt.err (!%p2087_p2)
}
   0xa   :  { %s2091_s10 = scalar_lea.vmem %s34_s25, 512  ;;  %p2096_p4 = scmp.lt.s32.totalorder %s34_s25, %s34_s25 }
   0xb   :  { %p2092_p3 = scmp.ne.s32.totalorder %s34_s25, %s2091_s10  ;;  %p2097_p5 = scmp.lt.s32.totalorder %s2091_s10, %s2091_s10 }
   0xd   :  { %p2098_p6 = por %p2097_p5, %p2096_p4 }
   0xf   :  { %p2099_p7 = pnand %p2098_p6, %p2092_p3 }
  0x11   :  { %2102 = shalt.err (!%p2099_p7)
}
  0x12   :  { %s2200_s11 = smov 256   ;;  %s2201_s12 = smov 16  }
  0x13   :  { %39 = dma.hbm_to_vmem [thread:$0]  %s2368_s1, 512, %s34_s25, [#allocation6], %s2200_s11, %s2200_s11, %s2201_s12  }
  0x14   :  { %s2202_s15 = smov [#allocation2]   ;;  %s2103_s19 = scalar_lea.hbm %s2367_s0, 128 }
  0x15   :  { %s21_s16 = sshll.u32 %s2202_s15, 4  ;;  %p2104_p8 = scmp.ne.s32.totalorder %s2367_s0, %s2103_s19  ;;  %s22_s16 = int_to_ptr.vmem [resolvable:$true] %s21_s16 }
  0x16   :  { %p2107_p9 = scmp.lt.u32.totalorder %s2103_s19, %s2367_s0 }
  0x18   :  { %p2109_p10 = pnand %p2107_p9, %p2104_p8 }
  0x1a   :  { %2112 = shalt.err (!%p2109_p10)
}
  0x1b   :  { %s2113_s24 = scalar_lea.vmem %s22_s16, 128  ;;  %p2118_p12 = scmp.lt.s32.totalorder %s22_s16, %s22_s16 }
  0x1c   :  { %p2114_p11 = scmp.ne.s32.totalorder %s22_s16, %s2113_s24  ;;  %p2119_p13 = scmp.lt.s32.totalorder %s2113_s24, %s2113_s24 }
  0x1e   :  { %p2120_p0 = por %p2119_p13, %p2118_p12 }
  0x20   :  { %p2121_p1 = pnand %p2120_p0, %p2114_p11 }
  0x22   :  { %2124 = shalt.err (!%p2121_p1)
}
  0x23   :  { %s2203_s1 = smov 64   ;;  %s2204_s25 = smov 4  }
  0x24   :  { %27 = dma.hbm_to_vmem [thread:$0]  %s2367_s0, 128, %s22_s16, [#allocation3], %s2203_s1, %s2203_s1, %s2204_s25  }
  0x25   :  { %s2205_s28 = smov [#allocation7]   ;;  %s2206_s30 = smov [#allocation8]  }
  0x26   :  { %s47_s29 = sshll.u32 %s2205_s28, 4  ;;  %s61_s8 = sshll.u32 %s2206_s30, 4  ;;  %s48_s29 = int_to_ptr.vmem [resolvable:$true] %s47_s29  ;;  %s2281_s8 = int_to_ptr.vmem [resolvable:$true] %s61_s8 }
  0x27   :  { %s2125_s13 = scalar_lea.hbm %s2370_s3, 16384 }
  0x28   :  { %p2126_p2 = scmp.ne.s32.totalorder %s2370_s3, %s2125_s13  ;;  %p2129_p3 = scmp.lt.u32.totalorder %s2125_s13, %s2370_s3 }
  0x2a   :  { %p2131_p4 = pnand %p2129_p3, %p2126_p2 }
  0x2c   :  { %2134 = shalt.err (!%p2131_p4)
}
  0x2d   :  { %s2135_s0 = scalar_lea.vmem %s48_s29, 16384  ;;  %p2140_p6 = scmp.lt.s32.totalorder %s48_s29, %s48_s29 }
  0x2e   :  { %p2136_p5 = scmp.ne.s32.totalorder %s48_s29, %s2135_s0  ;;  %p2141_p7 = scmp.lt.s32.totalorder %s2135_s0, %s2135_s0 }
  0x30   :  { %p2142_p8 = por %p2141_p7, %p2140_p6 }
  0x32   :  { %p2143_p9 = pnand %p2142_p8, %p2136_p5 }
  0x34   :  { %2146 = shalt.err (!%p2143_p9)
}
  0x35   :  { %53 = dma.hbm_to_vmem [thread:$0]  %s2370_s3, 16384, %s48_s29, [#allocation6], %s2200_s11, %s2200_s11, %s2201_s12  }
  0x36   :  { %s2147_s22 = scalar_lea.hbm %s2372_s5, 4096 }
  0x37   :  { %p2148_p10 = scmp.ne.s32.totalorder %s2372_s5, %s2147_s22  ;;  %p2151_p11 = scmp.lt.u32.totalorder %s2147_s22, %s2372_s5 }
  0x39   :  { %p2153_p12 = pnand %p2151_p11, %p2148_p10 }
  0x3b   :  { %2156 = shalt.err (!%p2153_p12)
}
  0x3c   :  { %s2157_s28 = scalar_lea.vmem %s2281_s8, 4096  ;;  %p2162_p0 = scmp.lt.s32.totalorder %s2281_s8, %s2281_s8 }
  0x3d   :  { %p2158_p13 = scmp.ne.s32.totalorder %s2281_s8, %s2157_s28  ;;  %p2163_p1 = scmp.lt.s32.totalorder %s2157_s28, %s2157_s28 }
  0x3f   :  { %p2164_p2 = por %p2163_p1, %p2162_p0 }
  0x41   :  { %p2165_p3 = pnand %p2164_p2, %p2158_p13 }
  0x43   :  { %2168 = shalt.err (!%p2165_p3)
}
  0x44   :  { %67 = dma.hbm_to_vmem [thread:$0]  %s2372_s5, 4096, %s2281_s8, [#allocation9], %s2203_s1, %s2203_s1, %s2204_s25  }
  0x45   :  { %2191 = dma.done.wait [#allocation3], 128  }
  0x46   :  { %2192 = vsyncadd [#allocation3], 4294967168 }
  0x47   :  { %2193 = dma.done.wait [#allocation6], 16896  }
  0x48   :  { %2194 = vsyncadd [#allocation6], 4294950400 }
  0x49   :  { %2195 = dma.done.wait [#allocation9], 4096  }
  0x4a   :  { %2196 = vsyncadd [#allocation9], 4294963200  ;;  %v2207_v0 = vmov 0   ;;  %v1818_v1 = vld [vmem:[#allocation5 + $0x4] ss:$16 sps:$4 sm:$0xff]   ;;  %v1821_v3 = vld [vmem:[#allocation2] sm:$0xff]  }
  0x4b   :  { %172 = vmatprep.mubr.bf16.mxu0 %v2207_v0  ;;  %215 = vmatprep.mubr.bf16.mxu1 %v2207_v0  ;;  %v1820_v2 = vld [vmem:[#allocation5] ss:$16 sps:$4 sm:$0xff]   ;;  %vm136_vm0 = vcmask 130048   ;;  %v1822_v4 = vld [vmem:[#allocation5 + $0xc] ss:$16 sps:$4 sm:$0xff]   ;;  %s2208_s29 = smov [#allocation10]  }
  0x4c   :  { %140 = vmatprep.subr.bf16.mxu0 %v1818_v1  ;;  %v1824_v5 = vld [vmem:[#allocation5 + $0x8] ss:$16 sps:$4 sm:$0xff]   ;;  %v1825_v6 = vld [vmem:[#allocation7] ss:$16 sps:$4 sm:$0xff]   ;;  %v1827_v7 = vld [vmem:[#allocation7 + $0x4] ss:$16 sps:$4 sm:$0xff]   ;;  %183 = vmatprep.subr.bf16.mxu1 %v1822_v4 }
  0x4d   :  { %141 = vmatpush1.bf16.msra.mxu0 %v1820_v2  ;;  %v1828_v8 = vld [vmem:[#allocation7 + $0x8] ss:$16 sps:$4 sm:$0xff]   ;;  %184 = vmatpush1.bf16.msra.mxu1 %v1824_v5  ;;  %v1830_v9 = vld [vmem:[#allocation7 + $0xc] ss:$16 sps:$4 sm:$0xff]   ;;  %v1833_v10 = vld [vmem:[#allocation7 + $0x24] ss:$16 sps:$4 sm:$0xff]  }
  0x4e   :  { %1028 = vmatprep.subr.bf16.mxu0 %v1827_v7  ;;  %1114 = vmatprep.subr.bf16.mxu1 %v1830_v9  ;;  %v1831_v11 = vld [vmem:[#allocation7 + $0x20] ss:$16 sps:$4 sm:$0xff]   ;;  %v1836_v12 = vld [vmem:[#allocation7 + $0x2c] ss:$16 sps:$4 sm:$0xff]   ;;  %v1834_v13 = vld [vmem:[#allocation7 + $0x28] ss:$16 sps:$4 sm:$0xff]  }
  0x4f   :  { %v1839_v14 = vld [vmem:[#allocation7 + $0x44] ss:$16 sps:$4 sm:$0xff]   ;;  %v1842_v15 = vld [vmem:[#allocation7 + $0x4c] ss:$16 sps:$4 sm:$0xff]   ;;  %v1837_v16 = vld [vmem:[#allocation7 + $0x40] ss:$16 sps:$4 sm:$0xff]  }
  0x50   :  { %1583 = vmatmul.mubr.msk.bf16.vlgmr.msra.gmra.mrb[0].mxu0 %vm136_vm0, %v1821_v3  ;;  %1584 = vmatmul.mubr.msk.bf16.vlgmr.msra.gmra.mrb[0].mxu1 %vm136_vm0, %v1821_v3  ;;  %v1845_v17 = vld [vmem:[#allocation7 + $0x64] ss:$16 sps:$4 sm:$0xff]   ;;  %v1840_v18 = vld [vmem:[#allocation7 + $0x48] ss:$16 sps:$4 sm:$0xff]   ;;  %v1848_v19 = vld [vmem:[#allocation7 + $0x6c] ss:$16 sps:$4 sm:$0xff]  }
  0x51   :  { %1029 = vmatpush1.bf16.msra.mxu0 %v1825_v6  ;;  %1115 = vmatpush1.bf16.msra.mxu1 %v1828_v8  ;;  %v1843_v20 = vld [vmem:[#allocation7 + $0x60] ss:$16 sps:$4 sm:$0xff]   ;;  %v1851_v21 = vld [vmem:[#allocation7 + $0x84] ss:$16 sps:$4 sm:$0xff]   ;;  %v1846_v22 = vld [vmem:[#allocation7 + $0x68] ss:$16 sps:$4 sm:$0xff]   ;;  %v91_v8 = vlaneseq }
  0x52   :  { %1030 = vmatprep.subr.bf16.mxu0 %v1833_v10  ;;  %1116 = vmatprep.subr.bf16.mxu1 %v1836_v12  ;;  %v1854_v23 = vld [vmem:[#allocation7 + $0x8c] ss:$16 sps:$4 sm:$0xff]   ;;  %v1849_v24 = vld [vmem:[#allocation7 + $0x80] ss:$16 sps:$4 sm:$0xff]   ;;  %v1857_v25 = vld [vmem:[#allocation7 + $0xa4] ss:$16 sps:$4 sm:$0xff]  }
  0x53   :  { %v1852_v26 = vld [vmem:[#allocation7 + $0x88] ss:$16 sps:$4 sm:$0xff]   ;;  %v1860_v27 = vld [vmem:[#allocation7 + $0xac] ss:$16 sps:$4 sm:$0xff]   ;;  %v1855_v28 = vld [vmem:[#allocation7 + $0xa0] ss:$16 sps:$4 sm:$0xff]  }
  0x54   :  { %v1863_v29 = vld [vmem:[#allocation7 + $0xc4] ss:$16 sps:$4 sm:$0xff]   ;;  %v1858_v30 = vld [vmem:[#allocation7 + $0xa8] ss:$16 sps:$4 sm:$0xff]   ;;  %v1866_v31 = vld [vmem:[#allocation7 + $0xcc] ss:$16 sps:$4 sm:$0xff]  }
  0x55   :  { %1031 = vmatpush1.bf16.msra.mxu0 %v1831_v11  ;;  %1117 = vmatpush1.bf16.msra.mxu1 %v1834_v13  ;;  %v1861_v32 = vld [vmem:[#allocation7 + $0xc0] ss:$16 sps:$4 sm:$0xff]   ;;  %v1869_v33 = vld [vmem:[#allocation7 + $0xe4] ss:$16 sps:$4 sm:$0xff]   ;;  %v1864_v34 = vld [vmem:[#allocation7 + $0xc8] ss:$16 sps:$4 sm:$0xff]  }
  0x56   :  { %1032 = vmatprep.subr.bf16.mxu0 %v1839_v14  ;;  %1118 = vmatprep.subr.bf16.mxu1 %v1842_v15  ;;  %v1872_v35 = vld [vmem:[#allocation7 + $0xec] ss:$16 sps:$4 sm:$0xff]   ;;  %v1867_v36 = vld [vmem:[#allocation7 + $0xe0] ss:$16 sps:$4 sm:$0xff]   ;;  %v1875_v37 = vld [vmem:[#allocation7 + $0x104] ss:$16 sps:$4 sm:$0xff]  }
  0x57   :  { %v1870_v38 = vld [vmem:[#allocation7 + $0xe8] ss:$16 sps:$4 sm:$0xff]   ;;  %v1873_v39 = vld [vmem:[#allocation7 + $0x100] ss:$16 sps:$4 sm:$0xff]   ;;  %v1878_v40 = vld [vmem:[#allocation7 + $0x10c] ss:$16 sps:$4 sm:$0xff]  }
  0x58   :  { %v1881_v41 = vld [vmem:[#allocation7 + $0x124] ss:$16 sps:$4 sm:$0xff]   ;;  %v1876_v42 = vld [vmem:[#allocation7 + $0x108] ss:$16 sps:$4 sm:$0xff]   ;;  %v1884_v43 = vld [vmem:[#allocation7 + $0x12c] ss:$16 sps:$4 sm:$0xff]  }
  0x59   :  { %1033 = vmatpush1.bf16.msra.mxu0 %v1837_v16  ;;  %1119 = vmatpush1.bf16.msra.mxu1 %v1840_v18  ;;  %v1879_v44 = vld [vmem:[#allocation7 + $0x120] ss:$16 sps:$4 sm:$0xff]   ;;  %v1887_v45 = vld [vmem:[#allocation7 + $0x144] ss:$16 sps:$4 sm:$0xff]   ;;  %v1882_v46 = vld [vmem:[#allocation7 + $0x128] ss:$16 sps:$4 sm:$0xff]  }
  0x5a   :  { %1034 = vmatprep.subr.bf16.mxu0 %v1845_v17  ;;  %1120 = vmatprep.subr.bf16.mxu1 %v1848_v19  ;;  %v1890_v47 = vld [vmem:[#allocation7 + $0x14c] ss:$16 sps:$4 sm:$0xff]   ;;  %v1885_v48 = vld [vmem:[#allocation7 + $0x140] ss:$16 sps:$4 sm:$0xff]   ;;  %v1893_v49 = vld [vmem:[#allocation7 + $0x164] ss:$16 sps:$4 sm:$0xff]  }
  0x5b   :  { %v1888_v50 = vld [vmem:[#allocation7 + $0x148] ss:$16 sps:$4 sm:$0xff]   ;;  %v1896_v51 = vld [vmem:[#allocation7 + $0x16c] ss:$16 sps:$4 sm:$0xff]   ;;  %v1891_v52 = vld [vmem:[#allocation7 + $0x160] ss:$16 sps:$4 sm:$0xff]  }
  0x5c   :  { %v1894_v53 = vld [vmem:[#allocation7 + $0x168] ss:$16 sps:$4 sm:$0xff]   ;;  %v1899_v54 = vld [vmem:[#allocation7 + $0x184] ss:$16 sps:$4 sm:$0xff]   ;;  %v1902_v55 = vld [vmem:[#allocation7 + $0x18c] ss:$16 sps:$4 sm:$0xff]  }
  0x5d   :  { %1035 = vmatpush1.bf16.msra.mxu0 %v1843_v20  ;;  %1121 = vmatpush1.bf16.msra.mxu1 %v1846_v22  ;;  %v1897_v56 = vld [vmem:[#allocation7 + $0x180] ss:$16 sps:$4 sm:$0xff]   ;;  %v1900_v57 = vld [vmem:[#allocation7 + $0x188] ss:$16 sps:$4 sm:$0xff]   ;;  %v1905_v58 = vld [vmem:[#allocation7 + $0x1a4] ss:$16 sps:$4 sm:$0xff]  }
  0x5e   :  { %1036 = vmatprep.subr.bf16.mxu0 %v1851_v21  ;;  %1122 = vmatprep.subr.bf16.mxu1 %v1854_v23  ;;  %v1908_v59 = vld [vmem:[#allocation7 + $0x1ac] ss:$16 sps:$4 sm:$0xff]   ;;  %v1903_v60 = vld [vmem:[#allocation7 + $0x1a0] ss:$16 sps:$4 sm:$0xff]   ;;  %v1906_v61 = vld [vmem:[#allocation7 + $0x1a8] ss:$16 sps:$4 sm:$0xff]  }
  0x5f   :  { %v1911_v62 = vld [vmem:[#allocation7 + $0x1c4] ss:$16 sps:$4 sm:$0xff]   ;;  %v1914_v63 = vld [vmem:[#allocation7 + $0x1cc] ss:$16 sps:$4 sm:$0xff]   ;;  %v1909_v0 = vld [vmem:[#allocation7 + $0x1c0] ss:$16 sps:$4 sm:$0xff]  }
  0x60   :  { %v1912_v1 = vld [vmem:[#allocation7 + $0x1c8] ss:$16 sps:$4 sm:$0xff]   ;;  %v1917_v2 = vld [vmem:[#allocation7 + $0x1e4] ss:$16 sps:$4 sm:$0xff]   ;;  %v1920_v3 = vld [vmem:[#allocation7 + $0x1ec] ss:$16 sps:$4 sm:$0xff]  }
  0x61   :  { %1037 = vmatpush1.bf16.msra.mxu0 %v1849_v24  ;;  %1123 = vmatpush1.bf16.msra.mxu1 %v1852_v26  ;;  %v1915_v4 = vld [vmem:[#allocation7 + $0x1e0] ss:$16 sps:$4 sm:$0xff]   ;;  %v1918_v5 = vld [vmem:[#allocation7 + $0x1e8] ss:$16 sps:$4 sm:$0xff]   ;;  %v1923_v6 = vld [vmem:[#allocation7 + $0x204] ss:$16 sps:$4 sm:$0xff]  }
  0x62   :  { %1038 = vmatprep.subr.bf16.mxu0 %v1857_v25  ;;  %1124 = vmatprep.subr.bf16.mxu1 %v1860_v27  ;;  %v1926_v7 = vld [vmem:[#allocation7 + $0x20c] ss:$16 sps:$4 sm:$0xff]   ;;  %v2320_v9 = vshrl.u32 %v91_v8, 7  ;;  %v89_v11 = vld [vmem:[%s2369_s2] sm:$0xf]  ;;  %s1564_s30 = sshll.u32 %s2208_s29, 4  ;;  %s1565_s30 = int_to_ptr.vmem [resolvable:$true] %s1564_s30 }
  0x63   :  { %v1960_v8 = vld [vmem:[#allocation7 + $0x2c8] ss:$16 sps:$4 sm:$0xff]   ;;  %p2174_p5 = scmp.lt.s32.totalorder %s1565_s30, %s1565_s30 }
  0x64   :  { %v93_v10 = vsub.s32 0, %v2320_v9  ;;  %v97_v12 = vsub.s32 1, %v2320_v9  ;;  %v101_v13 = vsub.s32 2, %v2320_v9  ;;  %v105_v15 = vsub.s32 3, %v2320_v9 }
  0x65   :  { %1039 = vmatpush1.bf16.msra.mxu0 %v1855_v28  ;;  %1125 = vmatpush1.bf16.msra.mxu1 %v1858_v30 }
  0x66   :  { %1040 = vmatprep.subr.bf16.mxu0 %v1863_v29  ;;  %1126 = vmatprep.subr.bf16.mxu1 %v1866_v31  ;;  %v94_v14 = vrot.slane %v89_v11, %v93_v10  ;;  %v98_v16 = vrot.slane %v89_v11, %v97_v12  ;;  %v102_v18 = vrot.slane %v89_v11, %v101_v13 }
  0x67   :  { %v106_v21 = vrot.slane %v89_v11, %v105_v15  ;;  %v1965_v11 = vld [vmem:[#allocation7 + $0x2e4] ss:$16 sps:$4 sm:$0xff]  }
  0x69   :  { %1041 = vmatpush1.bf16.msra.mxu0 %v1861_v32  ;;  %1127 = vmatpush1.bf16.msra.mxu1 %v1864_v34 }
  0x6a   :  { %1042 = vmatprep.subr.bf16.mxu0 %v1869_v33  ;;  %1128 = vmatprep.subr.bf16.mxu1 %v1872_v35 }
  0x6d   :  { %1043 = vmatpush1.bf16.msra.mxu0 %v1867_v36  ;;  %1129 = vmatpush1.bf16.msra.mxu1 %v1870_v38 }
  0x6e   :  { %1044 = vmatprep.subr.bf16.mxu0 %v1875_v37  ;;  %1130 = vmatprep.subr.bf16.mxu1 %v1878_v40 }
  0x71   :  { %1045 = vmatpush1.bf16.msra.mxu0 %v1873_v39  ;;  %1131 = vmatpush1.bf16.msra.mxu1 %v1876_v42  ;;  %v1921_v42 = vld [vmem:[#allocation7 + $0x200] ss:$16 sps:$4 sm:$0xff]  }
  0x72   :  { %1046 = vmatprep.subr.bf16.mxu0 %v1881_v41  ;;  %1132 = vmatprep.subr.bf16.mxu1 %v1884_v43  ;;  %v1924_v43 = vld [vmem:[#allocation7 + $0x208] ss:$16 sps:$4 sm:$0xff]  }
  0x75   :  { %1047 = vmatpush1.bf16.msra.mxu0 %v1879_v44  ;;  %1133 = vmatpush1.bf16.msra.mxu1 %v1882_v46  ;;  %v1932_v46 = vld [vmem:[#allocation7 + $0x22c] ss:$16 sps:$4 sm:$0xff]  }
  0x76   :  { %1048 = vmatprep.subr.bf16.mxu0 %v1887_v45  ;;  %1134 = vmatprep.subr.bf16.mxu1 %v1890_v47  ;;  %v1929_v45 = vld [vmem:[#allocation7 + $0x224] ss:$16 sps:$4 sm:$0xff]  }
  0x79   :  { %1049 = vmatpush1.bf16.msra.mxu0 %v1885_v48  ;;  %1135 = vmatpush1.bf16.msra.mxu1 %v1888_v50  ;;  %v1927_v50 = vld [vmem:[#allocation7 + $0x220] ss:$16 sps:$4 sm:$0xff]  }
  0x7a   :  { %1050 = vmatprep.subr.bf16.mxu0 %v1893_v49  ;;  %1136 = vmatprep.subr.bf16.mxu1 %v1896_v51  ;;  %v1930_v51 = vld [vmem:[#allocation7 + $0x228] ss:$16 sps:$4 sm:$0xff]  }
  0x7d   :  { %1051 = vmatpush1.bf16.msra.mxu0 %v1891_v52  ;;  %1137 = vmatpush1.bf16.msra.mxu1 %v1894_v53  ;;  %v1935_v53 = vld [vmem:[#allocation7 + $0x244] ss:$16 sps:$4 sm:$0xff]  }
  0x7e   :  { %1052 = vmatprep.subr.bf16.mxu0 %v1899_v54  ;;  %1138 = vmatprep.subr.bf16.mxu1 %v1902_v55  ;;  %v1938_v54 = vld [vmem:[#allocation7 + $0x24c] ss:$16 sps:$4 sm:$0xff]   ;;  %v1933_v55 = vld [vmem:[#allocation7 + $0x240] ss:$16 sps:$4 sm:$0xff]  }
  0x81   :  { %1053 = vmatpush1.bf16.msra.mxu0 %v1897_v56  ;;  %1139 = vmatpush1.bf16.msra.mxu1 %v1900_v57  ;;  %v1936_v56 = vld [vmem:[#allocation7 + $0x248] ss:$16 sps:$4 sm:$0xff]   ;;  %v1941_v57 = vld [vmem:[#allocation7 + $0x264] ss:$16 sps:$4 sm:$0xff]  }
  0x82   :  { %1054 = vmatprep.subr.bf16.mxu0 %v1905_v58  ;;  %1140 = vmatprep.subr.bf16.mxu1 %v1908_v59  ;;  %v1944_v58 = vld [vmem:[#allocation7 + $0x26c] ss:$16 sps:$4 sm:$0xff]   ;;  %v1939_v59 = vld [vmem:[#allocation7 + $0x260] ss:$16 sps:$4 sm:$0xff]  }
  0x85   :  { %1055 = vmatpush1.bf16.msra.mxu0 %v1903_v60  ;;  %1141 = vmatpush1.bf16.msra.mxu1 %v1906_v61  ;;  %v1942_v60 = vld [vmem:[#allocation7 + $0x268] ss:$16 sps:$4 sm:$0xff]   ;;  %v1947_v61 = vld [vmem:[#allocation7 + $0x284] ss:$16 sps:$4 sm:$0xff]  }
  0x86   :  { %1056 = vmatprep.subr.bf16.mxu0 %v1911_v62  ;;  %1142 = vmatprep.subr.bf16.mxu1 %v1914_v63  ;;  %v1950_v62 = vld [vmem:[#allocation7 + $0x28c] ss:$16 sps:$4 sm:$0xff]   ;;  %v1945_v63 = vld [vmem:[#allocation7 + $0x280] ss:$16 sps:$4 sm:$0xff]  }
  0x89   :  { %1057 = vmatpush1.bf16.msra.mxu0 %v1909_v0  ;;  %1143 = vmatpush1.bf16.msra.mxu1 %v1912_v1  ;;  %v1948_v0 = vld [vmem:[#allocation7 + $0x288] ss:$16 sps:$4 sm:$0xff]   ;;  %v1953_v1 = vld [vmem:[#allocation7 + $0x2a4] ss:$16 sps:$4 sm:$0xff]  }
  0x8a   :  { %1058 = vmatprep.subr.bf16.mxu0 %v1917_v2  ;;  %1144 = vmatprep.subr.bf16.mxu1 %v1920_v3  ;;  %v1956_v2 = vld [vmem:[#allocation7 + $0x2ac] ss:$16 sps:$4 sm:$0xff]   ;;  %v1951_v3 = vld [vmem:[#allocation7 + $0x2a0] ss:$16 sps:$4 sm:$0xff]  }
  0x8d   :  { %1059 = vmatpush1.bf16.msra.mxu0 %v1915_v4  ;;  %1145 = vmatpush1.bf16.msra.mxu1 %v1918_v5  ;;  %v1954_v4 = vld [vmem:[#allocation7 + $0x2a8] ss:$16 sps:$4 sm:$0xff]   ;;  %v1959_v5 = vld [vmem:[#allocation7 + $0x2c4] ss:$16 sps:$4 sm:$0xff]  }
  0x8e   :  { %1071 = vmatprep.subr.bf16.mxu0 %v1923_v6  ;;  %1157 = vmatprep.subr.bf16.mxu1 %v1926_v7  ;;  %v1962_v6 = vld [vmem:[#allocation7 + $0x2cc] ss:$16 sps:$4 sm:$0xff]   ;;  %v1957_v7 = vld [vmem:[#allocation7 + $0x2c0] ss:$16 sps:$4 sm:$0xff]  }
 0x123   :  { %v174_v17 = vpop.f32.mrb[0].mxu0  ;;  %v217_v26 = vpop.f32.mrb[0].mxu1 }
 0x124   :  { %v175_v19 = vadd.f32 %v174_v17, %v94_v14  ;;  %v176_v20 = vpop.f32.mrb[1].mxu0  ;;  %v218_v28 = vadd.f32 %v217_v26, %v102_v18  ;;  %v219_v29 = vpop.f32.mrb[1].mxu1  ;;  %v1966_v17 = vld [vmem:[#allocation7 + $0x2e8] ss:$16 sps:$4 sm:$0xff]   ;;  %v1983_v26 = vld [vmem:[#allocation7 + $0x344] ss:$16 sps:$4 sm:$0xff]  }
 0x125   :  { %v177_v22 = vadd.f32 %v176_v20, %v98_v16  ;;  %v178_v23 = vpop.f32.mrb[2].mxu0  ;;  %v220_v30 = vadd.f32 %v219_v29, %v106_v21  ;;  %v221_v31 = vpop.f32.mrb[2].mxu1  ;;  %v1969_v20 = vld [vmem:[#allocation7 + $0x300] ss:$16 sps:$4 sm:$0xff]   ;;  %v1984_v29 = vld [vmem:[#allocation7 + $0x348] ss:$16 sps:$4 sm:$0xff]  }
 0x126   :  { %2049 = vtanh.f32 %v175_v19  ;;  %v179_v24 = vadd.f32 %v178_v23, %v94_v14  ;;  %v180_v25 = vpop.f32.mrb[3].mxu0  ;;  %v222_v32 = vadd.f32 %v221_v31, %v102_v18  ;;  %v223_v33 = vpop.f32.mrb[3].mxu1  ;;  %v1968_v14 = vld [vmem:[#allocation7 + $0x2ec] ss:$16 sps:$4 sm:$0xff]   ;;  %v1971_v18 = vld [vmem:[#allocation7 + $0x304] ss:$16 sps:$4 sm:$0xff]  }
 0x127   :  { %2051 = vtanh.f32 %v177_v22  ;;  %v181_v27 = vadd.f32 %v180_v25, %v98_v16  ;;  %v224_v34 = vadd.f32 %v223_v33, %v106_v21  ;;  %v1963_v16 = vld [vmem:[#allocation7 + $0x2e0] ss:$16 sps:$4 sm:$0xff]   ;;  %v1974_v19 = vld [vmem:[#allocation7 + $0x30c] ss:$16 sps:$4 sm:$0xff]   ;;  %v1972_v21 = vld [vmem:[#allocation7 + $0x308] ss:$16 sps:$4 sm:$0xff]  }
 0x128   :  { %2053 = vtanh.f32 %v179_v24  ;;  %v1977_v22 = vld [vmem:[#allocation7 + $0x324] ss:$16 sps:$4 sm:$0xff]   ;;  %v1980_v23 = vld [vmem:[#allocation7 + $0x32c] ss:$16 sps:$4 sm:$0xff]   ;;  %v1975_v24 = vld [vmem:[#allocation7 + $0x320] ss:$16 sps:$4 sm:$0xff]  }
 0x129   :  { %2055 = vtanh.f32 %v181_v27  ;;  %v1978_v25 = vld [vmem:[#allocation7 + $0x328] ss:$16 sps:$4 sm:$0xff]   ;;  %v1986_v27 = vld [vmem:[#allocation7 + $0x34c] ss:$16 sps:$4 sm:$0xff]  }
 0x12a   :  { %2057 = vtanh.f32 %v218_v28  ;;  %v1981_v28 = vld [vmem:[#allocation7 + $0x340] ss:$16 sps:$4 sm:$0xff]   ;;  %v1992_v31 = vld [vmem:[#allocation7 + $0x36c] ss:$16 sps:$4 sm:$0xff]   ;;  %v1990_v33 = vld [vmem:[#allocation7 + $0x368] ss:$16 sps:$4 sm:$0xff]  }
 0x12b   :  { %2059 = vtanh.f32 %v220_v30  ;;  %v1989_v30 = vld [vmem:[#allocation7 + $0x364] ss:$16 sps:$4 sm:$0xff]  }
 0x12c   :  { %2061 = vtanh.f32 %v222_v32  ;;  %v1987_v32 = vld [vmem:[#allocation7 + $0x360] ss:$16 sps:$4 sm:$0xff]  }
 0x12d   :  { %2063 = vtanh.f32 %v224_v34  ;;  %v1995_v34 = vld [vmem:[#allocation7 + $0x384] ss:$16 sps:$4 sm:$0xff]  }
 0x130   :  { %v2050_v35 = vpop.eup %2049 }
 0x131   :  { %v2052_v36 = vpop.eup %2051 }
 0x132   :  { %v2054_v37 = vpop.eup %2053 }
 0x133   :  { %v2056_v38 = vpop.eup %2055  ;;  %v234_v39 = vpack.c.bf16 %v2054_v37, %v2050_v35  ;;  %v1998_v35 = vld [vmem:[#allocation7 + $0x38c] ss:$16 sps:$4 sm:$0xff]   ;;  %v1996_v37 = vld [vmem:[#allocation7 + $0x388] ss:$16 sps:$4 sm:$0xff]  }
 0x134   :  { %v2058_v40 = vpop.eup %2057  ;;  %v235_v41 = vpack.c.bf16 %v2056_v38, %v2052_v36  ;;  %v1993_v36 = vld [vmem:[#allocation7 + $0x380] ss:$16 sps:$4 sm:$0xff]   ;;  %v2001_v38 = vld [vmem:[#allocation7 + $0x3a4] ss:$16 sps:$4 sm:$0xff]  }
 0x135   :  { %v2060_v44 = vpop.eup %2059 }
 0x136   :  { %v2062_v47 = vpop.eup %2061  ;;  %1060 = vmatprep.mubr.bf16.mxu0 %v235_v41  ;;  %1146 = vmatprep.mubr.bf16.mxu1 %v235_v41  ;;  %v2002_v41 = vld [vmem:[#allocation7 + $0x3a8] ss:$16 sps:$4 sm:$0xff]  }
 0x137   :  { %v2064_v48 = vpop.eup %2063  ;;  %1061 = vmatmul.mubr.bf16.vlgmr.msra.gmra.mrb[4].mxu0 %v234_v39  ;;  %1147 = vmatmul.mubr.bf16.vlgmr.msra.gmra.mrb[4].mxu1 %v234_v39  ;;  %v2337_v49 = vpack.c.bf16 %v2062_v47, %v2058_v40  ;;  %v2004_v39 = vld [vmem:[#allocation7 + $0x3ac] ss:$16 sps:$4 sm:$0xff]   ;;  %v1999_v40 = vld [vmem:[#allocation7 + $0x3a0] ss:$16 sps:$4 sm:$0xff]  }
 0x138   :  { %1072 = vmatpush1.bf16.msra.mxu0 %v1921_v42  ;;  %1158 = vmatpush1.bf16.msra.mxu1 %v1924_v43  ;;  %v237_v52 = vpack.c.bf16 %v2064_v48, %v2060_v44  ;;  %v2007_v42 = vld [vmem:[#allocation7 + $0x3c4] ss:$16 sps:$4 sm:$0xff]   ;;  %v2010_v43 = vld [vmem:[#allocation7 + $0x3cc] ss:$16 sps:$4 sm:$0xff]   ;;  %v2005_v44 = vld [vmem:[#allocation7 + $0x3c0] ss:$16 sps:$4 sm:$0xff]  }
 0x139   :  { %1073 = vmatprep.subr.bf16.mxu0 %v1929_v45  ;;  %1159 = vmatprep.subr.bf16.mxu1 %v1932_v46  ;;  %v2008_v45 = vld [vmem:[#allocation7 + $0x3c8] ss:$16 sps:$4 sm:$0xff]   ;;  %v2013_v46 = vld [vmem:[#allocation7 + $0x3e4] ss:$16 sps:$4 sm:$0xff]   ;;  %v2016_v47 = vld [vmem:[#allocation7 + $0x3ec] ss:$16 sps:$4 sm:$0xff]  }
 0x13a   :  { %1103 = vmatprep.mubr.bf16.mxu0 %v237_v52  ;;  %1189 = vmatprep.mubr.bf16.mxu1 %v237_v52  ;;  %v2011_v48 = vld [vmem:[#allocation7 + $0x3e0] ss:$16 sps:$4 sm:$0xff]  }
 0x13b   :  { %v2018_v52 = vld [vmem:[#allocation8 + $0xc0] sm:$0xff]  }
 0x13c   :  { %1074 = vmatpush1.bf16.msra.mxu0 %v1927_v50  ;;  %1160 = vmatpush1.bf16.msra.mxu1 %v1930_v51  ;;  %v2014_v50 = vld [vmem:[#allocation7 + $0x3e8] ss:$16 sps:$4 sm:$0xff]   ;;  %v2017_v51 = vld [vmem:[#allocation8 + $0x40] sm:$0xff]  }
 0x13d   :  { %1075 = vmatprep.subr.bf16.mxu0 %v1935_v53  ;;  %1161 = vmatprep.subr.bf16.mxu1 %v1938_v54  ;;  %v2019_v53 = vld [vmem:[#allocation8] sm:$0xff]  }
 0x13e   :  { %v2020_v54 = vld [vmem:[#allocation8 + $0x80] sm:$0xff]  }
 0x140   :  { %1076 = vmatpush1.bf16.msra.mxu0 %v1933_v55  ;;  %1162 = vmatpush1.bf16.msra.mxu1 %v1936_v56  ;;  %v2021_v55 = vld [vmem:[#allocation8 + $0x48] sm:$0xff]  }
 0x141   :  { %1077 = vmatprep.subr.bf16.mxu0 %v1941_v57  ;;  %1163 = vmatprep.subr.bf16.mxu1 %v1944_v58  ;;  %v2022_v56 = vld [vmem:[#allocation8 + $0xc8] sm:$0xff]  }
 0x142   :  { %v2023_v57 = vld [vmem:[#allocation8 + $0x8] sm:$0xff]  }
 0x143   :  { %v2024_v58 = vld [vmem:[#allocation8 + $0x88] sm:$0xff]  }
 0x144   :  { %1078 = vmatpush1.bf16.msra.mxu0 %v1939_v59  ;;  %1164 = vmatpush1.bf16.msra.mxu1 %v1942_v60  ;;  %v2025_v59 = vld [vmem:[#allocation8 + $0x50] sm:$0xff]  }
 0x145   :  { %1079 = vmatprep.subr.bf16.mxu0 %v1947_v61  ;;  %1165 = vmatprep.subr.bf16.mxu1 %v1950_v62  ;;  %v2026_v60 = vld [vmem:[#allocation8 + $0xd0] sm:$0xff]  }
 0x146   :  { %v2027_v61 = vld [vmem:[#allocation8 + $0x10] sm:$0xff]  }
 0x147   :  { %v2028_v62 = vld [vmem:[#allocation8 + $0x90] sm:$0xff]  }
 0x148   :  { %1080 = vmatpush1.bf16.msra.mxu0 %v1945_v63  ;;  %1166 = vmatpush1.bf16.msra.mxu1 %v1948_v0  ;;  %v2029_v63 = vld [vmem:[#allocation8 + $0x58] sm:$0xff]  }
 0x149   :  { %1081 = vmatprep.subr.bf16.mxu0 %v1953_v1  ;;  %1167 = vmatprep.subr.bf16.mxu1 %v1956_v2  ;;  %v2030_v0 = vld [vmem:[#allocation8 + $0xd8] sm:$0xff]   ;;  %v2033_v2 = vld [vmem:[#allocation8 + $0x60] sm:$0xff]  }
 0x14a   :  { %v2032_v1 = vld [vmem:[#allocation8 + $0x98] sm:$0xff]  }
 0x14c   :  { %1082 = vmatpush1.bf16.msra.mxu0 %v1951_v3  ;;  %1168 = vmatpush1.bf16.msra.mxu1 %v1954_v4  ;;  %v2034_v3 = vld [vmem:[#allocation8 + $0xe0] sm:$0xff]  }
 0x14d   :  { %1083 = vmatprep.subr.bf16.mxu0 %v1959_v5  ;;  %1169 = vmatprep.subr.bf16.mxu1 %v1962_v6  ;;  %v2035_v4 = vld [vmem:[#allocation8 + $0x20] sm:$0xff]   ;;  %v2037_v6 = vld [vmem:[#allocation8 + $0x68] sm:$0xff]  }
 0x14e   :  { %v2036_v5 = vld [vmem:[#allocation8 + $0xa0] sm:$0xff]  }
 0x150   :  { %1084 = vmatpush1.bf16.msra.mxu0 %v1957_v7  ;;  %1170 = vmatpush1.bf16.msra.mxu1 %v1960_v8  ;;  %v2038_v7 = vld [vmem:[#allocation8 + $0xe8] sm:$0xff]  }
 0x151   :  { %1085 = vmatprep.subr.bf16.mxu0 %v1965_v11  ;;  %1171 = vmatprep.subr.bf16.mxu1 %v1968_v14  ;;  %v2039_v8 = vld [vmem:[#allocation8 + $0x28] sm:$0xff]   ;;  %v2041_v14 = vld [vmem:[#allocation8 + $0x70] sm:$0xff]  }
 0x152   :  { %v2040_v11 = vld [vmem:[#allocation8 + $0xa8] sm:$0xff]  }
 0x154   :  { %1086 = vmatpush1.bf16.msra.mxu0 %v1963_v16  ;;  %1172 = vmatpush1.bf16.msra.mxu1 %v1966_v17  ;;  %v2042_v16 = vld [vmem:[#allocation8 + $0xf0] sm:$0xff]  }
 0x155   :  { %1087 = vmatprep.subr.bf16.mxu0 %v1971_v18  ;;  %1173 = vmatprep.subr.bf16.mxu1 %v1974_v19  ;;  %v2043_v17 = vld [vmem:[#allocation8 + $0x30] sm:$0xff]   ;;  %v2045_v19 = vld [vmem:[#allocation8 + $0x78] sm:$0xff]  }
 0x156   :  { %v2044_v18 = vld [vmem:[#allocation8 + $0xb0] sm:$0xff]  }
 0x158   :  { %1088 = vmatpush1.bf16.msra.mxu0 %v1969_v20  ;;  %1174 = vmatpush1.bf16.msra.mxu1 %v1972_v21  ;;  %v2046_v20 = vld [vmem:[#allocation8 + $0xf8] sm:$0xff]  }
 0x159   :  { %1089 = vmatprep.subr.bf16.mxu0 %v1977_v22  ;;  %1175 = vmatprep.subr.bf16.mxu1 %v1980_v23  ;;  %v2047_v21 = vld [vmem:[#allocation8 + $0x38] sm:$0xff]  }
 0x15a   :  { %v2048_v22 = vld [vmem:[#allocation8 + $0xb8] sm:$0xff]  }
 0x15b   :  { %v366_v23 = vld [vmem:[%s2371_s4] sm:$0xf] }
 0x15c   :  { %1090 = vmatpush1.bf16.msra.mxu0 %v1975_v24  ;;  %1176 = vmatpush1.bf16.msra.mxu1 %v1978_v25  ;;  %v371_v24 = vrot.slane %v366_v23, %v93_v10  ;;  %v379_v25 = vrot.slane %v366_v23, %v101_v13 }
 0x15d   :  { %1091 = vmatprep.subr.bf16.mxu0 %v1983_v26  ;;  %1177 = vmatprep.subr.bf16.mxu1 %v1986_v27  ;;  %v375_v26 = vrot.slane %v366_v23, %v97_v12  ;;  %v383_v27 = vrot.slane %v366_v23, %v105_v15 }
 0x160   :  { %1092 = vmatpush1.bf16.msra.mxu0 %v1981_v28  ;;  %1178 = vmatpush1.bf16.msra.mxu1 %v1984_v29 }
 0x161   :  { %1093 = vmatprep.subr.bf16.mxu0 %v1989_v30  ;;  %1179 = vmatprep.subr.bf16.mxu1 %v1992_v31 }
 0x164   :  { %1094 = vmatpush1.bf16.msra.mxu0 %v1987_v32  ;;  %1180 = vmatpush1.bf16.msra.mxu1 %v1990_v33 }
 0x165   :  { %1095 = vmatprep.subr.bf16.mxu0 %v1995_v34  ;;  %1181 = vmatprep.subr.bf16.mxu1 %v1998_v35 }
 0x168   :  { %1096 = vmatpush1.bf16.msra.mxu0 %v1993_v36  ;;  %1182 = vmatpush1.bf16.msra.mxu1 %v1996_v37 }
 0x169   :  { %1097 = vmatprep.subr.bf16.mxu0 %v2001_v38  ;;  %1183 = vmatprep.subr.bf16.mxu1 %v2004_v39 }
 0x16c   :  { %1098 = vmatpush1.bf16.msra.mxu0 %v1999_v40  ;;  %1184 = vmatpush1.bf16.msra.mxu1 %v2002_v41 }
 0x16d   :  { %1099 = vmatprep.subr.bf16.mxu0 %v2007_v42  ;;  %1185 = vmatprep.subr.bf16.mxu1 %v2010_v43 }
 0x170   :  { %1100 = vmatpush1.bf16.msra.mxu0 %v2005_v44  ;;  %1186 = vmatpush1.bf16.msra.mxu1 %v2008_v45 }
 0x171   :  { %1101 = vmatprep.subr.bf16.mxu0 %v2013_v46  ;;  %1187 = vmatprep.subr.bf16.mxu1 %v2016_v47 }
 0x174   :  { %1102 = vmatpush1.bf16.msra.mxu0 %v2011_v48  ;;  %1188 = vmatpush1.bf16.msra.mxu1 %v2014_v50 }
 0x175   :  { %1746 = vmatprep.subr.bf16.mxu0 %v2017_v51  ;;  %1768 = vmatprep.subr.bf16.mxu1 %v2018_v52 }
 0x177   :  { %1104 = vmatmul.mubr.bf16.vlgmr.msra.gmra.mrb[4].mxu0 %v2337_v49  ;;  %1190 = vmatmul.mubr.bf16.vlgmr.msra.gmra.mrb[4].mxu1 %v2337_v49  ;;  %v2031_v49 = vld [vmem:[#allocation8 + $0x18] sm:$0xff]  }
 0x178   :  { %1747 = vmatpush3.bf16.msra.mxu0 %v2019_v53  ;;  %1769 = vmatpush3.bf16.msra.mxu1 %v2020_v54  ;;  %v1713_v54 = vld [vmem:[%s2373_s6] ss:$0 sm:$0xff]  ;;  %s2169_s6 = scalar_lea.vmem %s1565_s30, 256 }
 0x179   :  { %1748 = vmatprep.subr.bf16.mxu0 %v2021_v55  ;;  %1770 = vmatprep.subr.bf16.mxu1 %v2022_v56  ;;  %p2170_p4 = scmp.ne.s32.totalorder %s1565_s30, %s2169_s6  ;;  %p2175_p6 = scmp.lt.s32.totalorder %s2169_s6, %s2169_s6 }
 0x17b   :  { %p2176_p7 = por %p2175_p6, %p2174_p5 }
 0x17c   :  { %1749 = vmatpush3.bf16.msra.mxu0 %v2023_v57  ;;  %1771 = vmatpush3.bf16.msra.mxu1 %v2024_v58 }
 0x17d   :  { %1750 = vmatprep.subr.bf16.mxu0 %v2025_v59  ;;  %1772 = vmatprep.subr.bf16.mxu1 %v2026_v60  ;;  %p2177_p8 = pnand %p2176_p7, %p2170_p4 }
 0x180   :  { %1751 = vmatpush3.bf16.msra.mxu0 %v2027_v61  ;;  %1773 = vmatpush3.bf16.msra.mxu1 %v2028_v62 }
 0x181   :  { %1752 = vmatprep.subr.bf16.mxu0 %v2029_v63  ;;  %1774 = vmatprep.subr.bf16.mxu1 %v2030_v0 }
 0x184   :  { %1753 = vmatpush3.bf16.msra.mxu0 %v2031_v49  ;;  %1775 = vmatpush3.bf16.msra.mxu1 %v2032_v1 }
 0x185   :  { %1754 = vmatprep.subr.bf16.mxu0 %v2033_v2  ;;  %1776 = vmatprep.subr.bf16.mxu1 %v2034_v3 }
 0x188   :  { %1755 = vmatpush3.bf16.msra.mxu0 %v2035_v4  ;;  %1777 = vmatpush3.bf16.msra.mxu1 %v2036_v5 }
 0x189   :  { %1756 = vmatprep.subr.bf16.mxu0 %v2037_v6  ;;  %1778 = vmatprep.subr.bf16.mxu1 %v2038_v7 }
 0x18c   :  { %1757 = vmatpush3.bf16.msra.mxu0 %v2039_v8  ;;  %1779 = vmatpush3.bf16.msra.mxu1 %v2040_v11 }
 0x18d   :  { %1758 = vmatprep.subr.bf16.mxu0 %v2041_v14  ;;  %1780 = vmatprep.subr.bf16.mxu1 %v2042_v16 }
 0x190   :  { %1759 = vmatpush3.bf16.msra.mxu0 %v2043_v17  ;;  %1781 = vmatpush3.bf16.msra.mxu1 %v2044_v18 }
 0x191   :  { %1760 = vmatprep.subr.bf16.mxu0 %v2045_v19  ;;  %1782 = vmatprep.subr.bf16.mxu1 %v2046_v20 }
 0x194   :  { %1761 = vmatpush3.bf16.msra.mxu0 %v2047_v21  ;;  %1783 = vmatpush3.bf16.msra.mxu1 %v2048_v22 }
 0x24a   :  { %v1105_v28 = vpop.f32.mrb[4].mxu0  ;;  %v1191_v29 = vpop.f32.mrb[4].mxu1 }
 0x24b   :  { %v1790_v30 = vadd.f32 %v1105_v28, %v371_v24  ;;  %v1794_v31 = vadd.f32 %v1191_v29, %v379_v25  ;;  %v1107_v32 = vpop.f32.mrb[5].mxu0  ;;  %v1193_v33 = vpop.f32.mrb[5].mxu1 }
 0x24c   :  { %v1791_v34 = vadd.f32 %v1107_v32, %v375_v26  ;;  %v1795_v35 = vadd.f32 %v1193_v33, %v383_v27  ;;  %v1109_v36 = vpop.f32.mrb[6].mxu0  ;;  %v1195_v37 = vpop.f32.mrb[6].mxu1 }
 0x24d   :  { %2065 = vtanh.f32 %v1790_v30  ;;  %v1792_v10 = vadd.f32 %v1109_v36, %v371_v24  ;;  %v1111_v38 = vpop.f32.mrb[7].mxu0  ;;  %v1197_v13 = vpop.f32.mrb[7].mxu1  ;;  %v1796_v39 = vadd.f32 %v1195_v37, %v379_v25 }
 0x24e   :  { %2067 = vtanh.f32 %v1794_v31  ;;  %v1793_v12 = vadd.f32 %v1111_v38, %v375_v26  ;;  %v1797_v9 = vadd.f32 %v1197_v13, %v383_v27 }
 0x24f   :  { %2069 = vtanh.f32 %v1791_v34 }
 0x250   :  { %2071 = vtanh.f32 %v1795_v35 }
 0x251   :  { %2073 = vtanh.f32 %v1792_v10 }
 0x252   :  { %2075 = vtanh.f32 %v1796_v39 }
 0x253   :  { %2077 = vtanh.f32 %v1793_v12 }
 0x254   :  { %2079 = vtanh.f32 %v1797_v9 }
 0x257   :  { %v2066_v15 = vpop.eup %2065 }
 0x258   :  { %v2068_v40 = vpop.eup %2067 }
 0x259   :  { %v2070_v41 = vpop.eup %2069 }
 0x25a   :  { %v2072_v42 = vpop.eup %2071 }
 0x25b   :  { %v2074_v43 = vpop.eup %2073 }
 0x25c   :  { %v2076_v44 = vpop.eup %2075  ;;  %v1208_v45 = vpack.c.bf16 %v2074_v43, %v2066_v15 }
 0x25d   :  { %v2078_v46 = vpop.eup %2077  ;;  %v1210_v47 = vpack.c.bf16 %v2076_v44, %v2068_v40 }
 0x25e   :  { %v2080_v48 = vpop.eup %2079  ;;  %v1209_v50 = vpack.c.bf16 %v2078_v46, %v2070_v41 }
 0x25f   :  { %v1211_v51 = vpack.c.bf16 %v2080_v48, %v2072_v42 }
 0x260   :  { %1507 = vmatprep.mubr.bf16.mxu0 %v1209_v50 }
 0x261   :  { %1548 = vmatprep.mubr.bf16.mxu1 %v1211_v51  ;;  %1508 = vmatmul.mubr.bf16.vlgmr.msra.gmra.mrb[8].mxu0 %v1208_v45 }
 0x262   :  { %1549 = vmatmul.mubr.bf16.vlgmr.msra.gmra.mrb[8].mxu1 %v1210_v47 }
 0x334   :  { %v1762_v52 = vpop.f32.mrb[8].mxu0 }
 0x335   :  { %v1784_v53 = vpop.f32.mrb[8].mxu1  ;;  %v1763_v55 = vpop.f32.mrb[9].mxu0 }
 0x336   :  { %v1764_v56 = vadd.f32 %v1763_v55, %v1762_v52  ;;  %v1785_v57 = vpop.f32.mrb[9].mxu1  ;;  %v1765_v58 = vpop.f32.mrb[10].mxu0 }
 0x337   :  { %v1786_v59 = vadd.f32 %v1785_v57, %v1784_v53  ;;  %v1787_v60 = vpop.f32.mrb[10].mxu1  ;;  %v1766_v61 = vpop.f32.mrb[11].mxu0 }
 0x338   :  { %v1510_v62 = vadd.f32 %v1764_v56, %v1713_v54  ;;  %v1767_v63 = vadd.f32 %v1766_v61, %v1765_v58  ;;  %v1788_v0 = vpop.f32.mrb[11].mxu1 }
 0x339   :  { %v1789_v49 = vadd.f32 %v1788_v0, %v1787_v60 }
 0x33a   :  { %v1551_v1 = vadd.f32 %v1786_v59, %v1510_v62  ;;  %v1513_v2 = vadd.f32 %v1767_v63, %v1713_v54 }
 0x33c   :  { %1557 = vst [vmem:[#allocation10] sm:$0xff] %v1551_v1  ;;  %v1554_v3 = vadd.f32 %v1789_v49, %v1513_v2 }
 0x33e   :  { %1558 = vst [vmem:[#allocation10 + $0x8] sm:$0xff] %v1554_v3 }
 0x33f   :  { %2180 = shalt.err (!%p2177_p8)
}
 0x340   :  { %s2181_s10 = scalar_lea.hbm %s2374_s7, 256 }
 0x341   :  { %p2182_p9 = scmp.ne.s32.totalorder %s2374_s7, %s2181_s10  ;;  %p2185_p10 = scmp.lt.u32.totalorder %s2181_s10, %s2374_s7 }
 0x343   :  { %p2187_p11 = pnand %p2185_p10, %p2182_p9 }
 0x345   :  { %2190 = shalt.err (!%p2187_p11)
}
 0x346   :  { %s2209_s18 = smov 128   ;;  %s2210_s0 = smov 8  }
 0x347   :  { %1570 = dma.vmem_to_hbm [thread:$0]  %s1565_s30, 256, %s2374_s7, [#allocation4], %s2209_s18, %s2209_s18, %s2210_s0  }
 0x348   :  { %2197 = dma.done.wait [#allocation4], 256  }
 0x349   :  { %2198 = vsyncadd [#allocation4], 4294967040 }
 0x34a   :  { %1574 = vsyncpa [#allocation3], 1 }
 0x34b   :  { %1575 = vsyncpa [#allocation6], 1 }
 0x34c   :  { %1576 = vsyncpa [#allocation9], 1 }
 0x34d   :  { %1577 = vsyncpa [#allocation4], 1 }

</bundles_post_ra>
